<compile_context>
chip_gen: v5e
topology: v5e:2x2
jax: 0.10.0
libtpu: 0.0.40
codegen_flags: <defaults>
</compile_context>

<pallas_src>
import jax
import jax.numpy as jnp
from jax import lax
from jax.experimental import pallas as pl
from jax.experimental.pallas import tpu as pltpu


def _total_loss_kernel(vid_ref, lab_ref, cas_ref, pa_ref, bkg_ref, out_ref):
    cas = cas_ref[0].astype(jnp.float32)    # (C+1, Tt)  channel-major, lane-dense
    pa = pa_ref[0].astype(jnp.float32)      # (C,   Tt)  (no zero column appended)
    bkg = bkg_ref[0].astype(jnp.float32)    # (1,   Tt)  lane-dense bkg seed

    C = pa.shape[0]
    cas_a = cas[:C, :]                      # action rows
    cas_l = cas[C:, :]                      # background (last) row

    # nn.BCELoss clamps its log outputs at -100.
    lc_a = jnp.maximum(jnp.log(cas_a), -100.0)
    l1m_a = jnp.maximum(jnp.log(1.0 - cas_a), -100.0)
    lc_l = jnp.maximum(jnp.log(cas_l), -100.0)
    l1m_l = jnp.maximum(jnp.log(1.0 - cas_l), -100.0)

    # ---- loss_frame partials (implicit all-zero background target column) ---
    w_act = jnp.max(pa, axis=0, keepdims=True)                      # (1, Tt)
    d = pa + cas_a - 2.0 * pa * cas_a                               # focal base
    focal_a = d * d
    bce_a = -(pa * lc_a + (1.0 - pa) * l1m_a)
    col_act = jnp.sum(focal_a * bce_a, axis=0, keepdims=True)       # (1, Tt)
    # implicit last column (target 0): focal = cas^2, bce = -log(1-cas)
    col_act = col_act + (cas_l * cas_l) * (-l1m_l)
    act_loss = jnp.sum(col_act * w_act, axis=1, keepdims=True)      # (1, 1)
    num_act = jnp.sum(w_act, axis=1, keepdims=True)

    # ---- loss_frame_bkg_001 partials (one-hot-last target, never built) -----
    # c < C : focal = cas^2,      bce = -log(1-cas)
    # c = C : focal = (1-cas)^2,  bce = -log(cas)
    col_bkg = jnp.sum((cas_a * cas_a) * (-l1m_a), axis=0, keepdims=True)
    col_bkg = col_bkg + ((1.0 - cas_l) ** 2) * (-lc_l)
    bkg_loss = jnp.sum(col_bkg * bkg, axis=1, keepdims=True)        # (1, 1)
    num_bkg = jnp.sum(bkg, axis=1, keepdims=True)

    # ---- video-level BCE (tiny; recomputed per tile, consumed from tile 0) --
    vs = vid_ref[0].astype(jnp.float32)                             # (1, C)
    y = lab_ref[0].astype(jnp.float32)
    lvs = jnp.maximum(jnp.log(vs), -100.0)
    l1vs = jnp.maximum(jnp.log(1.0 - vs), -100.0)
    vid_sum = jnp.sum(-(y * lvs + (1.0 - y) * l1vs), axis=1, keepdims=True)

    # Pack the 5 per-(batch, tile) scalars into one lane-dense 128-wide row.
    lane = lax.broadcasted_iota(jnp.int32, (1, 128), 1)
    out = jnp.where(lane == 0, vid_sum, 0.0)
    out = jnp.where(lane == 1, act_loss, out)
    out = jnp.where(lane == 2, num_act, out)
    out = jnp.where(lane == 3, bkg_loss, out)
    out = jnp.where(lane == 4, num_bkg, out)
    out_ref[0, 0] = out.astype(jnp.float32)


def _pick_t_tile(T, n_rows, elem_bytes=4, budget_bytes=12 * 1024 * 1024):
    """Largest 128-multiple T tile whose double-buffered input footprint fits."""
    cap = budget_bytes // max(1, 2 * n_rows * elem_bytes)
    tile = max(128, min(8192, (cap // 128) * 128))
    return min(tile, ((T + 127) // 128) * 128)


def _run_frame_losses(vid_score, label, cas_sigmoid_fuse, point_anno, bkg_seed,
                      t_tile=None):
    """Per-(batch, T-tile) stats (B, nt, 128); lanes 0..4 =
       [BCE(vid) sum, act_loss_sum, num_actions, bkg_loss_sum, num_bkg]."""
    B, T, C1 = cas_sigmoid_fuse.shape
    C = point_anno.shape[2]

    # Channel-major (lane = time) layout for the big per-frame tensors.
    cas_t = jnp.transpose(cas_sigmoid_fuse, (0, 2, 1))    # (B, C+1, T)
    pa_t = jnp.transpose(point_anno, (0, 2, 1))           # (B, C,   T)
    bkg_t = bkg_seed.reshape(B, 1, T)                     # (B, 1, T): metadata-only

    n_rows = C1 + C + 1
    if t_tile is None or t_tile <= 0 or t_tile % 128 != 0:
        t_tile = _pick_t_tile(T, n_rows)
    nt = pl.cdiv(T, t_tile)
    T_pad = nt * t_tile
    if T_pad != T:
        # Padded frames have zero act/bkg weight, so they contribute exactly 0.
        pad = ((0, 0), (0, 0), (0, T_pad - T))
        cas_t = jnp.pad(cas_t, pad, constant_values=0.5)   # keeps logs finite
        pa_t = jnp.pad(pa_t, pad, constant_values=0.0)
        bkg_t = jnp.pad(bkg_t, pad, constant_values=0.0)

    vid_r = vid_score.reshape(B, 1, C)
    lab_r = label.reshape(B, 1, C)

    stats = pl.pallas_call(
        _total_loss_kernel,
        out_shape=jax.ShapeDtypeStruct((B, nt, 1, 128), jnp.float32),
        grid=(B, nt),
        in_specs=[
            pl.BlockSpec((1, 1, C), lambda b, t: (b, 0, 0)),          # vid_score
            pl.BlockSpec((1, 1, C), lambda b, t: (b, 0, 0)),          # label
            pl.BlockSpec((1, C1, t_tile), lambda b, t: (b, 0, t)),    # cas (ch-major)
            pl.BlockSpec((1, C, t_tile), lambda b, t: (b, 0, t)),     # point_anno
            pl.BlockSpec((1, 1, t_tile), lambda b, t: (b, 0, t)),     # bkg seed
        ],
        out_specs=pl.BlockSpec((1, 1, 1, 128), lambda b, t: (b, t, 0, 0)),
        compiler_params=pltpu.CompilerParams(
            dimension_semantics=("parallel", "parallel"),
            vmem_limit_bytes=32 * 1024 * 1024),
    )(vid_r, lab_r, cas_t, pa_t, bkg_t)
    return stats.reshape(B, nt, 128)


def total_loss_forward(vid_score, cas_sigmoid_fuse, features, stored_info,
                       label, point_anno, step, bkg_ann, lambdas, t_tile=None):
    """JAX/Pallas equivalent of Total_loss.forward (tau=0.1, sampling_size=3)."""
    B, T, C = point_anno.shape

    # bkg_seed_001 branch: bkg_ann is nonzero, so it is used directly.
    # TODO(synk): utils.select_seed (used for loss_frame_bkg_000 and as the
    # fallback when bkg_ann is all-zero) is an external, undefined utility with
    # data-dependent host logic; it is not reproduced here.
    bkg_seed_001 = bkg_ann

    stats = _run_frame_losses(vid_score, label, cas_sigmoid_fuse, point_anno,
                              bkg_seed_001, t_tile=t_tile)
    vid_sum = stats[:, 0, 0]                   # identical in every tile
    act_l = jnp.sum(stats[:, :, 1], axis=1)
    act_n = jnp.sum(stats[:, :, 2], axis=1)
    bkg_l = jnp.sum(stats[:, :, 3], axis=1)
    bkg_n = jnp.sum(stats[:, :, 4], axis=1)

    loss_vid = jnp.sum(vid_sum) / float(B * C)
    loss_frame = jnp.mean(act_l / act_n)
    # PyTorch quirk: numerator has shape (B,), denominator (B,1) ->
    # broadcast to (B,B) before .mean(); mean(n[j]/d[i]) == mean(n)*mean(1/d).
    loss_frame_bkg_001 = jnp.mean(bkg_l) * jnp.mean(1.0 / bkg_n)
    loss_frame_bkg = loss_frame_bkg_001  # (+ loss_frame_bkg_000, see TODO above)

    # stored_info['new_dense_anno'] is 1-D here, so the refinement branch is
    # skipped exactly as in the PyTorch forward (losses stay zero).
    # TODO(synk): loss_score_act / loss_score_bkg / loss_feat refinement branch
    # uses torch.nonzero / .tolist() host loops over variable-length intervals
    # and utils.feature_sampling / get_oic_score; no clean Pallas equivalent.
    loss_score_act = jnp.float32(0.0)
    loss_score_bkg = jnp.float32(0.0)
    loss_feat = jnp.float32(0.0)
    loss_score = (loss_score_act + loss_score_bkg) ** 2

    loss_total = (lambdas[0] * loss_vid + lambdas[1] * loss_frame
                  + lambdas[2] * loss_frame_bkg + lambdas[3] * loss_score
                  + lambdas[4] * loss_feat)

    loss = {
        "loss_vid": loss_vid,
        "loss_frame": loss_frame,
        "loss_frame_bkg": loss_frame_bkg,
        "loss_score_act": loss_score_act,
        "loss_score_bkg": loss_score_bkg,
        "loss_score": loss_score,
        "loss_feat": loss_feat,
        "loss_total": loss_total,
    }
    return loss_total, loss


def _reference_losses(vid_score, cas, label, point_anno, bkg_ann):
    """Pure-jnp mirror of the implemented paths (for a numeric sanity check)."""
    def bce(p, y):
        return -(y * jnp.maximum(jnp.log(p), -100.0)
                 + (1.0 - y) * jnp.maximum(jnp.log(1.0 - p), -100.0))
    B, T, C = point_anno.shape
    loss_vid = jnp.mean(bce(vid_score, label))
    pa = jnp.concatenate([point_anno, jnp.zeros((B, T, 1), point_anno.dtype)], 2)
    w_act = jnp.max(pa, axis=2, keepdims=True)
    num_act = jnp.sum(jnp.max(pa, axis=2), axis=1)
    focal_act = ((1.0 - cas) * pa + cas * (1.0 - pa)) ** 2
    loss_frame = jnp.mean(
        jnp.sum(focal_act * bce(cas, pa) * w_act, axis=(1, 2)) / num_act)
    pa_bkg = jnp.zeros_like(pa).at[:, :, -1].set(1.0)
    num_bkg = jnp.sum(bkg_ann, axis=1)                               # (B, 1)
    focal_bkg = ((1.0 - cas) * pa_bkg + cas * (1.0 - pa_bkg)) ** 2
    numer = jnp.sum(focal_bkg * bce(cas, pa_bkg) * bkg_ann, axis=(1, 2))  # (B,)
    loss_frame_bkg = jnp.mean(numer / num_bkg)     # (B,)/(B,1) -> (B,B) quirk
    return loss_vid, loss_frame, loss_frame_bkg


if __name__ == "__main__":
    import numpy as np

    key = jax.random.PRNGKey(0)
    k1, k2, k3, k4, k5, k6 = jax.random.split(key, 6)

    B, T, C, F = 2, 200, 20, 32        # T not a multiple of 128: exercises padding
    C1 = C + 1

    vid_score = jax.nn.sigmoid(jax.random.normal(k1, (B, C), jnp.float32))
    label = (jax.random.uniform(k2, (B, C)) < 0.3).astype(jnp.float32)
    label = label.at[:, 0].set(1.0)                      # >=1 gt class per video
    cas_sigmoid_fuse = jax.nn.sigmoid(
        jax.random.normal(k3, (B, T, C1), jnp.float32))
    point_anno = (jax.random.uniform(k4, (B, T, C)) < 0.05).astype(jnp.float32)
    point_anno = point_anno.at[:, 0, 0].set(1.0)         # num_actions > 0
    bkg_ann = (jax.random.uniform(k5, (B, T, 1)) < 0.3).astype(jnp.float32)
    bkg_ann = bkg_ann.at[:, 1, 0].set(1.0)               # num_bkg > 0, nonzero ann
    features = jax.random.normal(k6, (B, T, F), jnp.float32)  # unused in this path
    stored_info = {"new_dense_anno": jnp.zeros((1,), jnp.float32)}  # 1-D -> skip
    step = 0
    lambdas = (1.0, 1.0, 1.0, 1.0, 1.0)

    loss_total, loss = total_loss_forward(
        vid_score, cas_sigmoid_fuse, features, stored_info,
        label, point_anno, step, bkg_ann, lambdas, t_tile=128)  # 2 T-tiles + pad
    jax.block_until_ready(loss_total)

    ref_vid, ref_frame, ref_bkg = _reference_losses(
        vid_score, cas_sigmoid_fuse, label, point_anno, bkg_ann)
    ref_total = ref_vid + ref_frame + ref_bkg
    np.testing.assert_allclose(float(loss["loss_vid"]), float(ref_vid),
                               rtol=1e-4, atol=1e-6)
    np.testing.assert_allclose(float(loss["loss_frame"]), float(ref_frame),
                               rtol=1e-4, atol=1e-6)
    np.testing.assert_allclose(float(loss["loss_frame_bkg"]), float(ref_bkg),
                               rtol=1e-4, atol=1e-6)
    np.testing.assert_allclose(float(loss_total), float(ref_total),
                               rtol=1e-4, atol=1e-6)
    print("KERNEL_OK")
</pallas_src>

<mosaic_0001>
module attributes {stable_mosaic.version = 11 : i64} {
  func.func @_total_loss_kernel(%arg0: i32, %arg1: i32, %arg2: memref<1x1x20xf32, #tpu.memory_space<vmem>>, %arg3: memref<1x1x20xf32, #tpu.memory_space<vmem>>, %arg4: memref<1x21x128xf32, #tpu.memory_space<vmem>>, %arg5: memref<1x20x128xf32, #tpu.memory_space<vmem>>, %arg6: memref<1x1x128xf32, #tpu.memory_space<vmem>>, %arg7: memref<1x1x1x128xf32, #tpu.memory_space<vmem>>) attributes {dimension_semantics = [#tpu.dimension_semantics<parallel>, #tpu.dimension_semantics<parallel>], iteration_bounds = array<i64: 2, 2>, scalar_prefetch = 0 : i64, scratch_operands = 0 : i64, tpu.core_type = #tpu.core_type<tc>, window_params = [{transform_indices = @transform_0, window_bounds = array<i64: 1, 1, 20>}, {transform_indices = @transform_1, window_bounds = array<i64: 1, 1, 20>}, {transform_indices = @transform_2, window_bounds = array<i64: 1, 21, 128>}, {transform_indices = @transform_3, window_bounds = array<i64: 1, 20, 128>}, {transform_indices = @transform_4, window_bounds = array<i64: 1, 1, 128>}, {transform_indices = @transform_5, window_bounds = array<i64: 1, 1, 1, 128>}]} {
    %c0 = arith.constant 0 : index
    %c0_0 = arith.constant 0 : index
    %c0_1 = arith.constant 0 : index
    %0 = vector.load %arg4[%c0, %c0_0, %c0_1] : memref<1x21x128xf32, #tpu.memory_space<vmem>>, vector<1x21x128xf32>
    %1 = vector.shape_cast %0 : vector<1x21x128xf32> to vector<21x128xf32>
    %c0_2 = arith.constant 0 : index
    %c0_3 = arith.constant 0 : index
    %c0_4 = arith.constant 0 : index
    %2 = vector.load %arg5[%c0_2, %c0_3, %c0_4] : memref<1x20x128xf32, #tpu.memory_space<vmem>>, vector<1x20x128xf32>
    %3 = vector.shape_cast %2 : vector<1x20x128xf32> to vector<20x128xf32>
    %c0_5 = arith.constant 0 : index
    %c0_6 = arith.constant 0 : index
    %c0_7 = arith.constant 0 : index
    %4 = vector.load %arg6[%c0_5, %c0_6, %c0_7] : memref<1x1x128xf32, #tpu.memory_space<vmem>>, vector<1x1x128xf32>
    %5 = vector.shape_cast %4 : vector<1x1x128xf32> to vector<1x128xf32>
    %6 = vector.extract_strided_slice %1 {offsets = [0, 0], sizes = [20, 128], strides = [1, 1]} : vector<21x128xf32> to vector<20x128xf32>
    %7 = vector.extract_strided_slice %1 {offsets = [20, 0], sizes = [1, 128], strides = [1, 1]} : vector<21x128xf32> to vector<1x128xf32>
    %8 = math.log %6 : vector<20x128xf32>
    %cst = arith.constant -1.000000e+02 : f32
    %9 = vector.broadcast %cst : f32 to vector<20x128xf32>
    %10 = arith.maximumf %8, %9 : vector<20x128xf32>
    %cst_8 = arith.constant 1.000000e+00 : f32
    %11 = vector.broadcast %cst_8 : f32 to vector<20x128xf32>
    %12 = arith.subf %11, %6 : vector<20x128xf32>
    %13 = math.log %12 : vector<20x128xf32>
    %cst_9 = arith.constant -1.000000e+02 : f32
    %14 = vector.broadcast %cst_9 : f32 to vector<20x128xf32>
    %15 = arith.maximumf %13, %14 : vector<20x128xf32>
    %16 = math.log %7 : vector<1x128xf32>
    %cst_10 = arith.constant -1.000000e+02 : f32
    %17 = vector.broadcast %cst_10 : f32 to vector<1x128xf32>
    %18 = arith.maximumf %16, %17 : vector<1x128xf32>
    %cst_11 = arith.constant 1.000000e+00 : f32
    %19 = vector.broadcast %cst_11 : f32 to vector<1x128xf32>
    %20 = arith.subf %19, %7 : vector<1x128xf32>
    %21 = math.log %20 : vector<1x128xf32>
    %cst_12 = arith.constant -1.000000e+02 : f32
    %22 = vector.broadcast %cst_12 : f32 to vector<1x128xf32>
    %23 = arith.maximumf %21, %22 : vector<1x128xf32>
    %cst_13 = arith.constant dense<0xFF800000> : vector<128xf32>
    %24 = vector.multi_reduction <maximumf>, %3, %cst_13 [0] : vector<20x128xf32> to vector<128xf32>
    %25 = vector.shape_cast %24 : vector<128xf32> to vector<1x128xf32>
    %26 = arith.addf %3, %6 : vector<20x128xf32>
    %cst_14 = arith.constant 2.000000e+00 : f32
    %27 = vector.broadcast %cst_14 : f32 to vector<20x128xf32>
    %28 = arith.mulf %27, %3 : vector<20x128xf32>
    %29 = arith.mulf %28, %6 : vector<20x128xf32>
    %30 = arith.subf %26, %29 : vector<20x128xf32>
    %31 = arith.mulf %30, %30 : vector<20x128xf32>
    %32 = arith.mulf %3, %10 : vector<20x128xf32>
    %cst_15 = arith.constant 1.000000e+00 : f32
    %33 = vector.broadcast %cst_15 : f32 to vector<20x128xf32>
    %34 = arith.subf %33, %3 : vector<20x128xf32>
    %35 = arith.mulf %34, %15 : vector<20x128xf32>
    %36 = arith.addf %32, %35 : vector<20x128xf32>
    %cst_16 = arith.constant 0.000000e+00 : f32
    %37 = vector.broadcast %cst_16 : f32 to vector<20x128xf32>
    %38 = arith.subf %37, %36 : vector<20x128xf32>
    %39 = arith.mulf %31, %38 : vector<20x128xf32>
    %cst_17 = arith.constant dense<0.000000e+00> : vector<128xf32>
    %40 = vector.multi_reduction <add>, %39, %cst_17 [0] : vector<20x128xf32> to vector<128xf32>
    %41 = vector.shape_cast %40 : vector<128xf32> to vector<1x128xf32>
    %42 = arith.mulf %7, %7 : vector<1x128xf32>
    %cst_18 = arith.constant 0.000000e+00 : f32
    %43 = vector.broadcast %cst_18 : f32 to vector<1x128xf32>
    %44 = arith.subf %43, %23 : vector<1x128xf32>
    %45 = arith.mulf %42, %44 : vector<1x128xf32>
    %46 = arith.addf %41, %45 : vector<1x128xf32>
    %47 = arith.mulf %46, %25 : vector<1x128xf32>
    %cst_19 = arith.constant dense<0.000000e+00> : vector<1xf32>
    %48 = vector.multi_reduction <add>, %47, %cst_19 [1] : vector<1x128xf32> to vector<1xf32>
    %49 = vector.shape_cast %48 : vector<1xf32> to vector<1x1xf32>
    %cst_20 = arith.constant dense<0.000000e+00> : vector<1xf32>
    %50 = vector.multi_reduction <add>, %25, %cst_20 [1] : vector<1x128xf32> to vector<1xf32>
    %51 = vector.shape_cast %50 : vector<1xf32> to vector<1x1xf32>
    %52 = arith.mulf %6, %6 : vector<20x128xf32>
    %cst_21 = arith.constant 0.000000e+00 : f32
    %53 = vector.broadcast %cst_21 : f32 to vector<20x128xf32>
    %54 = arith.subf %53, %15 : vector<20x128xf32>
    %55 = arith.mulf %52, %54 : vector<20x128xf32>
    %cst_22 = arith.constant dense<0.000000e+00> : vector<128xf32>
    %56 = vector.multi_reduction <add>, %55, %cst_22 [0] : vector<20x128xf32> to vector<128xf32>
    %57 = vector.shape_cast %56 : vector<128xf32> to vector<1x128xf32>
    %cst_23 = arith.constant 1.000000e+00 : f32
    %58 = vector.broadcast %cst_23 : f32 to vector<1x128xf32>
    %59 = arith.subf %58, %7 : vector<1x128xf32>
    %60 = arith.mulf %59, %59 : vector<1x128xf32>
    %cst_24 = arith.constant 0.000000e+00 : f32
    %61 = vector.broadcast %cst_24 : f32 to vector<1x128xf32>
    %62 = arith.subf %61, %18 : vector<1x128xf32>
    %63 = arith.mulf %60, %62 : vector<1x128xf32>
    %64 = arith.addf %57, %63 : vector<1x128xf32>
    %65 = arith.mulf %64, %5 : vector<1x128xf32>
    %cst_25 = arith.constant dense<0.000000e+00> : vector<1xf32>
    %66 = vector.multi_reduction <add>, %65, %cst_25 [1] : vector<1x128xf32> to vector<1xf32>
    %67 = vector.shape_cast %66 : vector<1xf32> to vector<1x1xf32>
    %cst_26 = arith.constant dense<0.000000e+00> : vector<1xf32>
    %68 = vector.multi_reduction <add>, %5, %cst_26 [1] : vector<1x128xf32> to vector<1xf32>
    %69 = vector.shape_cast %68 : vector<1xf32> to vector<1x1xf32>
    %c0_27 = arith.constant 0 : index
    %c0_28 = arith.constant 0 : index
    %c0_29 = arith.constant 0 : index
    %70 = vector.load %arg2[%c0_27, %c0_28, %c0_29] : memref<1x1x20xf32, #tpu.memory_space<vmem>>, vector<1x1x20xf32>
    %71 = vector.shape_cast %70 : vector<1x1x20xf32> to vector<1x20xf32>
    %c0_30 = arith.constant 0 : index
    %c0_31 = arith.constant 0 : index
    %c0_32 = arith.constant 0 : index
    %72 = vector.load %arg3[%c0_30, %c0_31, %c0_32] : memref<1x1x20xf32, #tpu.memory_space<vmem>>, vector<1x1x20xf32>
    %73 = vector.shape_cast %72 : vector<1x1x20xf32> to vector<1x20xf32>
    %74 = math.log %71 : vector<1x20xf32>
    %cst_33 = arith.constant -1.000000e+02 : f32
    %75 = vector.broadcast %cst_33 : f32 to vector<1x20xf32>
    %76 = arith.maximumf %74, %75 : vector<1x20xf32>
    %cst_34 = arith.constant 1.000000e+00 : f32
    %77 = vector.broadcast %cst_34 : f32 to vector<1x20xf32>
    %78 = arith.subf %77, %71 : vector<1x20xf32>
    %79 = math.log %78 : vector<1x20xf32>
    %cst_35 = arith.constant -1.000000e+02 : f32
    %80 = vector.broadcast %cst_35 : f32 to vector<1x20xf32>
    %81 = arith.maximumf %79, %80 : vector<1x20xf32>
    %82 = arith.mulf %73, %76 : vector<1x20xf32>
    %cst_36 = arith.constant 1.000000e+00 : f32
    %83 = vector.broadcast %cst_36 : f32 to vector<1x20xf32>
    %84 = arith.subf %83, %73 : vector<1x20xf32>
    %85 = arith.mulf %84, %81 : vector<1x20xf32>
    %86 = arith.addf %82, %85 : vector<1x20xf32>
    %cst_37 = arith.constant 0.000000e+00 : f32
    %87 = vector.broadcast %cst_37 : f32 to vector<1x20xf32>
    %88 = arith.subf %87, %86 : vector<1x20xf32>
    %cst_38 = arith.constant dense<0.000000e+00> : vector<1xf32>
    %89 = vector.multi_reduction <add>, %88, %cst_38 [1] : vector<1x20xf32> to vector<1xf32>
    %90 = vector.shape_cast %89 : vector<1xf32> to vector<1x1xf32>
    %91 = tpu.iota {dimensions = array<i32: 1>} : vector<1x128xi32>
    %c0_i32 = arith.constant 0 : i32
    %92 = vector.broadcast %c0_i32 : i32 to vector<1x128xi32>
    %93 = arith.cmpi eq, %91, %92 : vector<1x128xi32>
    %cst_39 = arith.constant 0.000000e+00 : f32
    %94 = vector.shape_cast %90 : vector<1x1xf32> to vector<1x1xf32>
    %95 = vector.broadcast %94 : vector<1x1xf32> to vector<1x128xf32>
    %96 = vector.broadcast %cst_39 : f32 to vector<1x128xf32>
    %97 = arith.select %93, %95, %96 : vector<1x128xi1>, vector<1x128xf32>
    %c1_i32 = arith.constant 1 : i32
    %98 = vector.broadcast %c1_i32 : i32 to vector<1x128xi32>
    %99 = arith.cmpi eq, %91, %98 : vector<1x128xi32>
    %100 = vector.shape_cast %49 : vector<1x1xf32> to vector<1x1xf32>
    %101 = vector.broadcast %100 : vector<1x1xf32> to vector<1x128xf32>
    %102 = arith.select %99, %101, %97 : vector<1x128xi1>, vector<1x128xf32>
    %c2_i32 = arith.constant 2 : i32
    %103 = vector.broadcast %c2_i32 : i32 to vector<1x128xi32>
    %104 = arith.cmpi eq, %91, %103 : vector<1x128xi32>
    %105 = vector.shape_cast %51 : vector<1x1xf32> to vector<1x1xf32>
    %106 = vector.broadcast %105 : vector<1x1xf32> to vector<1x128xf32>
    %107 = arith.select %104, %106, %102 : vector<1x128xi1>, vector<1x128xf32>
    %c3_i32 = arith.constant 3 : i32
    %108 = vector.broadcast %c3_i32 : i32 to vector<1x128xi32>
    %109 = arith.cmpi eq, %91, %108 : vector<1x128xi32>
    %110 = vector.shape_cast %67 : vector<1x1xf32> to vector<1x1xf32>
    %111 = vector.broadcast %110 : vector<1x1xf32> to vector<1x128xf32>
    %112 = arith.select %109, %111, %107 : vector<1x128xi1>, vector<1x128xf32>
    %c4_i32 = arith.constant 4 : i32
    %113 = vector.broadcast %c4_i32 : i32 to vector<1x128xi32>
    %114 = arith.cmpi eq, %91, %113 : vector<1x128xi32>
    %115 = vector.shape_cast %69 : vector<1x1xf32> to vector<1x1xf32>
    %116 = vector.broadcast %115 : vector<1x1xf32> to vector<1x128xf32>
    %117 = arith.select %114, %116, %112 : vector<1x128xi1>, vector<1x128xf32>
    %c0_40 = arith.constant 0 : index
    %c0_41 = arith.constant 0 : index
    %c0_42 = arith.constant 0 : index
    %c0_43 = arith.constant 0 : index
    %118 = vector.load %arg7[%c0_40, %c0_41, %c0_42, %c0_43] : memref<1x1x1x128xf32, #tpu.memory_space<vmem>>, vector<1x1x1x128xf32>
    %119 = vector.shape_cast %118 : vector<1x1x1x128xf32> to vector<1x128xf32>
    %120 = vector.shape_cast %117 : vector<1x128xf32> to vector<1x1x1x128xf32>
    tpu.vector_store %arg7[%c0_40, %c0_41, %c0_42, %c0_43], %120 {strides = array<i32>} : memref<1x1x1x128xf32, #tpu.memory_space<vmem>>, vector<1x1x1x128xf32>,
    return
  }
  func.func @transform_0(%arg0: i32, %arg1: i32) -> (i32, i32, i32) {
    %c0_i32 = arith.constant 0 : i32
    %c0_i32_0 = arith.constant 0 : i32
    %c0_i32_1 = arith.constant 0 : i32
    return %arg0, %c0_i32, %c0_i32_0 : i32, i32, i32
  }
  func.func @transform_1(%arg0: i32, %arg1: i32) -> (i32, i32, i32) {
    %c0_i32 = arith.constant 0 : i32
    %c0_i32_0 = arith.constant 0 : i32
    %c0_i32_1 = arith.constant 0 : i32
    return %arg0, %c0_i32, %c0_i32_0 : i32, i32, i32
  }
  func.func @transform_2(%arg0: i32, %arg1: i32) -> (i32, i32, i32) {
    %c0_i32 = arith.constant 0 : i32
    %c0_i32_0 = arith.constant 0 : i32
    return %arg0, %c0_i32, %arg1 : i32, i32, i32
  }
  func.func @transform_3(%arg0: i32, %arg1: i32) -> (i32, i32, i32) {
    %c0_i32 = arith.constant 0 : i32
    %c0_i32_0 = arith.constant 0 : i32
    return %arg0, %c0_i32, %arg1 : i32, i32, i32
  }
  func.func @transform_4(%arg0: i32, %arg1: i32) -> (i32, i32, i32) {
    %c0_i32 = arith.constant 0 : i32
    %c0_i32_0 = arith.constant 0 : i32
    return %arg0, %c0_i32, %arg1 : i32, i32, i32
  }
  func.func @transform_5(%arg0: i32, %arg1: i32) -> (i32, i32, i32, i32) {
    %c0_i32 = arith.constant 0 : i32
    %c0_i32_0 = arith.constant 0 : i32
    %c0_i32_1 = arith.constant 0 : i32
    return %arg0, %arg1, %c0_i32, %c0_i32_0 : i32, i32, i32, i32
  }
}

</mosaic_0001>

<bundles_post_ra>
// kernel: tpu_custom_call.1
= control target key start
LH: loop header
LB: loop body
LE: loop exit
PB: predicated region body
PF: predicated region fallthrough
CT: control target
= control target key end

     0   :  { %10 = vsyncpa [#allocation5], 0  ;;  %s1146_s0 = inlined_call_operand.vmem [shape: f32[2,1,20], index: 0, kind: input, shape index: {}]   ;;  %s1147_s1 = inlined_call_operand.vmem [shape: f32[2,1,20], index: 1, kind: input, shape index: {}]   ;;  %s1148_s2 = inlined_call_operand.vmem [shape: f32[2,21,256], index: 2, kind: input, shape index: {}]   ;;  %s1149_s3 = inlined_call_operand.vmem [shape: f32[2,20,256], index: 3, kind: input, shape index: {}]   ;;  %s1150_s4 = inlined_call_operand.vmem [shape: f32[2,1,256], index: 4, kind: input, shape index: {}]   ;;  %s1151_s5 = inlined_call_operand.hbm [shape: f32[2,2,1,128], index: 5, kind: output, shape index: {}]  }
   0x1   :  { %12 = vsyncpa [#allocation5 + $0x1], 0  ;;  %s938_s18 = smov 0   ;;  %s940_s19 = smov 0  }
   0x2   :  { %s942_s20 = smov 0   ;;  %s944_s21 = smov 0  }
   0x3   :  { %s946_s22 = smov 0   ;;  %s948_s23 = smov 0  }
   0x4   :  { %s950_s24 = smov 0   ;;  %s952_s25 = smov 0  }
   0x5 LB: > { %s708_s26 = sadd.s32 4294967295, %s906_s25   ;;  %s709_s27 = sadd.s32 4294967294, %s906_s25   ;;  %s906_s25 = sphi %s952_s25, %s18_s25   ;;  %s902_s24 = sphi %s950_s24, %s1161_s24   ;;  %s898_s23 = sphi %s948_s23, %s1160_s23   ;;  %s894_s22 = sphi %s946_s22, %s1159_s22   ;;  %s890_s21 = sphi %s944_s21, %s1158_s21   ;;  %s886_s20 = sphi %s942_s20, %s1157_s20   ;;  %s882_s19 = sphi %s940_s19, %s1156_s19   ;;  %s878_s18 = sphi %s938_s18, %s1155_s18  }
   0x6   : > { %s27_s28 = sadd.s32 1, %s898_s23  ;;  %s30_s29 = sadd.s32 1, %s902_s24 }
   0x7   : > { %p28_p0 = scmp.ge.s32.totalorder %s27_s28, 2  ;;  %p98_p1 = scmp.ne.s32.totalorder %s886_s20, %s882_s19 }
   0x8   : > { %p99_p2 = scmp.eq.s32.totalorder %s906_s25, 0  ;;  %p186_p5 = scmp.eq.s32.totalorder %s708_s26, 3 }
   0x9   : > { %s1163_s28 = smov (%p28_p0, %s27_s28), 0  ;;  %s1165_s29 = smov (!%p28_p0, %s30_s29), %s902_s24 }
   0xa   : > { %s87_s30 = ssub.s32 %s898_s23, %s1163_s28  ;;  %p990_p3 = por %p99_p2, %p98_p1 }
   0xb   : > { %p32_p4 = scmp.ge.s32.totalorder %s1165_s29, 2  ;;  %p191_p6 = scmp.ne.s32.totalorder %s882_s19, %s878_s18 }
   0xc   : > { %p192_p7 = scmp.eq.s32.totalorder %s709_s27, 3  ;;  %p998_p8 = por %p186_p5, %p98_p1 }
   0xd   : > { %s1167_s29 = smov (%p32_p4, %s1165_s29), 0  ;;  %s91_s11 = sadd.s32 1, %s886_s20 }
   0xe   : > { %p1002_p9 = por %p192_p7, %p191_p6  ;;  %s86_s9 = ssub.s32 %s902_s24, %s1167_s29 }
   0xf   : > { %s88_s10 = sor.u32 %s87_s30, %s86_s9  ;;  %p711_p11 = scmp.ge.s32.totalorder %s906_s25, 4 }
  0x10   : > { %p89_p10 = scmp.eq.s32.totalorder %s88_s10, 0 }
  0x11   : > { %208 = sbr.rel (%p711_p11) target bundleno = 42 (0x2a), region = 16 }
  0x12   : > { %s1010_s12 = scalar_select %p89_p10, %s886_s20, %s91_s11  }
  0x16   : > { %223 = sbr.rel (!%p990_p3) target bundleno = 32 (0x20), region = 28  ;;  %s225_s13 = sand.u32 (%p990_p3), 1, %s886_s20  }
  0x17   : > { %s720_s14 = smul.u32 (%p990_p3), 6, %s902_s24 }
  0x18   : > { %s719_s15 = smul.u32 (%p990_p3), 24, %s225_s13 }
  0x19   : > { %s229_s16 = sadd.s32 (%p990_p3), %s898_s23, %s720_s14 }
  0x1a   : > { %s712_s17 = sshll.u32 (%p990_p3), %s229_s16, 3  ;;  %s227_s9 = scalar_lea.vmem (%p990_p3), [#allocation2], %s719_s15 }
  0x1b   : > { %s231_s30 = scalar_lea.vmem %s1148_s2, %s712_s17 }
  0x1c   : > { %v264_v0 = vld [vmem:[%s231_s30] sm:$0xff]  ;;  %v266_v1 = vld [vmem:[%s231_s30 + $0x10] sm:$0xff] }
  0x1d   : > { %v268_v2 = vld [vmem:[%s231_s30 + $0x20] sm:$0xff]  ;;  %265 = vst [vmem:[%s227_s9] sm:$0xff] %v264_v0 }
  0x1e   : > { %267 = vst [vmem:[%s227_s9 + $0x8] sm:$0xff] %v266_v1 }
  0x1f   : > { %269 = vst [vmem:[%s227_s9 + $0x10] sm:$0xff] %v268_v2 }
  0x20 PF: > { %275 = sbr.rel (!%p990_p3) target bundleno = 42 (0x2a), region = 66  ;;  %s277_s10 = sand.u32 (%p990_p3), 1, %s886_s20  }
  0x21   : > { %s722_s11 = smul.u32 (%p990_p3), 6, %s902_s24 }
  0x22   : > { %s721_s13 = smul.u32 (%p990_p3), 24, %s277_s10 }
  0x23   : > { %s281_s14 = sadd.s32 (%p990_p3), %s898_s23, %s722_s11 }
  0x24   : > { %s713_s16 = sshll.u32 (%p990_p3), %s281_s14, 3  ;;  %s279_s15 = scalar_lea.vmem (%p990_p3), [#allocation3], %s721_s13 }
  0x25   : > { %s283_s27 = scalar_lea.vmem %s1149_s3, %s713_s16 }
  0x26   : > { %v316_v3 = vld [vmem:[%s283_s27] sm:$0xff]  ;;  %v318_v4 = vld [vmem:[%s283_s27 + $0x10] sm:$0xff] }
  0x27   : > { %v320_v5 = vld [vmem:[%s283_s27 + $0x20] sm:$0xff]  ;;  %317 = vst [vmem:[%s279_s15] sm:$0xff] %v316_v3 }
  0x28   : > { %319 = vst [vmem:[%s279_s15 + $0x8] sm:$0xff] %v318_v4 }
  0x29   : > { %321 = vst [vmem:[%s279_s15 + $0x10] sm:$0xff] %v320_v5 }
  0x2a PF: > { %p714_p12 = scmp.ge.s32.totalorder %s906_s25, 1  ;;  %p336_p13 = scmp.lt.s32.totalorder %s906_s25, 5 }
  0x2c   : > { %p337_p0 = pnand %p714_p12, %p336_p13 }
  0x2d   : > { %p393_p1 = scmp.lt.s32.totalorder (!%p337_p0), %s894_s22, 1  ;;  %s1033_s6 = sand.u32 (!%p337_p0), 1, %s882_s19  }
  0x2e   : > { %340 = sbr.rel (%p337_p0) target bundleno = 226 (0xe2), region = 108  ;;  %p401_p2 = scmp.lt.s32.totalorder (!%p337_p0), %s890_s21, 1 }
  0x2f   : > { %s723_s30 = smul.u32 (!%p337_p0), 24, %s1033_s6 }
  0x31   : > { %s352_s14 = scalar_lea.vmem (!%p337_p0), [#allocation3], %s723_s30  ;;  %s345_s16 = scalar_lea.vmem (!%p337_p0), [#allocation2], %s723_s30 }
  0x33   : > { %s1037_s9 = scalar_select %p393_p1, %s894_s22, 1  ;;  %vm434_vm0 = vcmask 1043456   ;;  %v1043_v6 = vld [vmem:[%s352_s14] sm:$0xff]  ;;  %v1045_v7 = vld [vmem:[%s352_s14 + $0x8] sm:$0xff]  ;;  %v1047_v8 = vld [vmem:[%s352_s14 + $0x10] sm:$0xf] }
  0x34   : > { %v435_v10 = vsel %vm434_vm0, %v1047_v8, -inf  ;;  %v436_v11 = vmax.f32 %v1043_v6, %v1045_v7  ;;  %v447_v13 = vmul.f32 2.0, %v1043_v6  ;;  %v448_v14 = vmul.f32 2.0, %v1045_v7  ;;  %v406_v15 = vld [vmem:[%s345_s16] sm:$0xff]  ;;  %v1055_v16 = vld [vmem:[%s345_s16 + $0x8] sm:$0xff]  ;;  %s402_s15 = scalar_select %p401_p2, %s890_s21, 1 }
  0x35   : > { %s395_s13 = scalar_lea.vmem %s1146_s0, %s1037_s9  ;;  %s398_s27 = scalar_lea.vmem %s1147_s1, %s1037_s9  ;;  %v449_v18 = vmul.f32 2.0, %v1047_v8  ;;  %v408_v19 = vld [vmem:[%s345_s16 + $0x10] sm:$0x1f]  ;;  %v422_v20 = vsub.f32 1.0, %v406_v15  ;;  %v423_v21 = vsub.f32 1.0, %v1055_v16  ;;  %v444_v22 = vadd.f32 %v1043_v6, %v406_v15 }
  0x36   : > { %v527_v9 = vld [vmem:[%s395_s13] sm:$0x1]  ;;  %v437_v17 = vmax.f32 %v436_v11, %v435_v10  ;;  %v1065_v24 = vsub.f32 1.0, %v408_v19  ;;  %v445_v26 = vadd.f32 %v1045_v7, %v1055_v16  ;;  %v450_v27 = vmul.f32 %v447_v13, %v406_v15  ;;  %s715_s30 = sshll.u32 %s1037_s9, 1  ;;  %s716_s14 = sshll.u32 %s894_s22, 1 }
  0x37   : > { %796 = vlog2.f32 %v527_v9  ;;  %v532_v12 = vsub.f32 1.0, %v527_v9  ;;  %v528_v25 = vld [vmem:[%s398_s27] sm:$0x1]  ;;  %v451_v28 = vmul.f32 %v448_v14, %v1055_v16  ;;  %v446_v30 = vadd.f32 %v1047_v8, %v408_v19  ;;  %s404_s10 = sadd.s32 %s715_s30, %s402_s15  ;;  %s574_s16 = sadd.s32 %s890_s21, %s716_s14 }
  0x38   : > { %798 = vlog2.f32 %v406_v15  ;;  %v438_v23 = vrot.slane %v437_v17, 4  ;;  %v452_v31 = vmul.f32 %v449_v18, %v408_v19  ;;  %v453_v33 = vsub.f32 %v444_v22, %v450_v27  ;;  %s1091_s13 = scalar_lea.vmem %s1150_s4, %s404_s10  ;;  %s575_s27 = scalar_lea.hbm %s1151_s5, %s574_s16 }
  0x39   : > { %800 = vlog2.f32 %v532_v12  ;;  %v537_v36 = vsub.f32 1.0, %v528_v25  ;;  %vm541_vm1 = vcmask 155648   ;;  %v454_v40 = vsub.f32 %v445_v26, %v451_v28  ;;  %v412_v18 = vld [vmem:[%s1091_s13] sm:$0x1]  ;;  %s392_s15 = scalar_lea.vmem [#allocation4], %s1033_s6  ;;  %s579_s10 = sshll.u32 %s575_s27, 4  ;;  %s580_s10 = int_to_ptr.hbm [resolvable:$true] %s579_s10 }
  0x3a   : > { %802 = vlog2.f32 %v1055_v16  ;;  %v439_v29 = vmax.f32 %v437_v17, %v438_v23  ;;  %v462_v41 = vsub.f32 1.0, %v1043_v6  ;;  %v463_v42 = vsub.f32 1.0, %v1045_v7  ;;  %s577_s30 = sshll.u32 %s392_s15, 4  ;;  %s565_s21 = scalar_lea.sflag [#allocation5], %s1033_s6  ;;  %s578_s30 = int_to_ptr.vmem [resolvable:$true] %s577_s30 }
  0x3b   : > { %804 = vlog2.f32 %v408_v19  ;;  %v455_v47 = vsub.f32 %v446_v30, %v452_v31  ;;  %v456_v51 = vmul.f32 %v453_v33, %v453_v33  ;;  %v464_v52 = vsub.f32 1.0, %v1047_v8  ;;  %s826_s22 = sshra.s32 %s580_s10, 4  ;;  %s832_s14 = scalar_lea.hbm %s1151_s5, 4  ;;  %s827_s22 = int_to_ptr.hbm [resolvable:$true] %s826_s22 }
  0x3c   : > { %806 = vlog2.f32 %v422_v20  ;;  %v440_v37 = vrot.slane %v439_v29, 2  ;;  %v486_v61 = vmul.f32 %v408_v19, %v408_v19  ;;  %v497_v62 = vmul.f32 %v406_v15, %v406_v15  ;;  %s828_s9 = scalar_lea.hbm %s827_s22, 1  ;;  %p833_p6 = scmp.lt.s32.totalorder %s827_s22, %s1151_s5 }
  0x3d   : > { %v797_v32 = vpop.eup %796  ;;  %808 = vlog2.f32 %v423_v21  ;;  %v498_v10 = vmul.f32 %v1055_v16, %v1055_v16  ;;  %vm523_vm2 = vcmask 1040384   ;;  %v457_v19 = vmul.f32 %v454_v40, %v454_v40  ;;  %p829_p3 = scmp.ne.s32.totalorder %s827_s22, %s828_s9  ;;  %p834_p7 = scmp.lt.s32.totalorder %s832_s14, %s828_s9 }
  0x3e   : > { %v799_v34 = vpop.eup %798  ;;  %v530_v35 = vmul.f32 0.6931472, %v797_v32  ;;  %810 = vlog2.f32 %v1065_v24  ;;  %v441_v46 = vmax.f32 %v439_v29, %v440_v37  ;;  %v524_v28 = vsel %vm523_vm2, %v412_v18, 0.0 }
  0x3f   : > { %v801_v38 = vpop.eup %800  ;;  %v414_v39 = vmul.f32 0.6931472, %v799_v34  ;;  %v458_v29 = vmul.f32 %v455_v47, %v455_v47  ;;  %525 = vadd.xlane.f32.xlu2 %v524_v28  ;;  %vm491_vm3 = vcmask 1044484   ;;  %p830_p4 = pnand %p829_p3, %p998_p8  ;;  %p835_p10 = por %p834_p7, %p833_p6 }
  0x40   : > { %v803_v43 = vpop.eup %802  ;;  %v531_v44 = vmax.f32 %v530_v35, -100.0  ;;  %v534_v45 = vmul.f32 0.6931472, %v801_v38  ;;  %v442_v56 = vrot.slane %v441_v46, 1 }
  0x41   : > { %v805_v48 = vpop.eup %804  ;;  %v416_v49 = vmul.f32 0.6931472, %v803_v43  ;;  %v419_v50 = vmax.f32 %v414_v39, -100.0  ;;  %p831_p5 = pneg %p830_p4 }
  0x42   : > { %v807_v53 = vpop.eup %806  ;;  %v535_v54 = vmax.f32 %v534_v45, -100.0  ;;  %v536_v55 = vmul.f32 %v531_v44, %v528_v25  ;;  %v418_v57 = vmul.f32 0.6931472, %v805_v48  ;;  %v1080_v1 = vmax.f32 %v441_v46, %v442_v56 }
  0x43   : > { %v809_v58 = vpop.eup %808  ;;  %v420_v59 = vmax.f32 %v416_v49, -100.0  ;;  %v426_v60 = vmul.f32 0.6931472, %v807_v53  ;;  %v459_v9 = vmul.f32 %v419_v50, %v1043_v6  ;;  %v512_v48 = vmul.f32 %v1065_v24, %v1065_v24  ;;  %p836_p11 = pnand %p835_p10, %p831_p5 }
  0x44   : > { %v811_v63 = vpop.eup %810  ;;  %v538_v0 = vmul.f32 %v537_v36, %v535_v54  ;;  %v421_v2 = vmax.f32 %v418_v57, -100.0  ;;  %v428_v3 = vmul.f32 0.6931472, %v809_v58  ;;  %495 = vadd.xlane.f32.xlu1 %v1080_v1  ;;  %v795_v57 = vld [vmem:[%s1091_s13] ss:$0 sm:$0xff] }
  0x45   : > { %v430_v4 = vmul.f32 0.6931472, %v811_v63  ;;  %v431_v5 = vmax.f32 %v426_v60, -100.0  ;;  %v460_v13 = vmul.f32 %v420_v59, %v1045_v7 }
  0x46   : > { %v539_v11 = vadd.f32 %v538_v0, %v536_v55  ;;  %v432_v12 = vmax.f32 %v428_v3, -100.0  ;;  %v461_v14 = vmul.f32 %v421_v2, %v1047_v8  ;;  %v513_v49 = vsub.f32 0.0, %v421_v2 }
  0x47   : > { %v433_v15 = vmax.f32 %v430_v4, -100.0  ;;  %v465_v17 = vmul.f32 %v462_v41, %v431_v5  ;;  %v499_v6 = vsub.f32 0.0, %v431_v5  ;;  %v545_v2 = vlaneseq }
  0x48   : > { %v540_v16 = vsub.f32 0.0, %v539_v11  ;;  %v466_v20 = vmul.f32 %v463_v42, %v432_v12  ;;  %v500_v21 = vsub.f32 0.0, %v432_v12  ;;  %v514_v54 = vmul.f32 %v513_v49, %v512_v48 }
  0x49   : > { %v467_v22 = vmul.f32 %v464_v52, %v433_v15  ;;  %v468_v23 = vadd.f32 %v465_v17, %v459_v9  ;;  %v487_v7 = vsub.f32 0.0, %v433_v15  ;;  %v501_v25 = vmul.f32 %v499_v6, %v497_v62 }
  0x4a   : > { %v542_v8 = vsel %vm541_vm1, %v540_v16, 0.0  ;;  %v469_v26 = vadd.f32 %v466_v20, %v460_v13  ;;  %v502_v27 = vmul.f32 %v500_v21, %v498_v10  ;;  %v546_v3 = vand.u32 127, %v545_v2 }
  0x4b   : > { %543 = vadd.xlane.f32.xlu0 %v542_v8  ;;  %v470_v30 = vadd.f32 %v467_v22, %v461_v14  ;;  %v471_v31 = vsub.f32 0.0, %v468_v23  ;;  %v488_v32 = vmul.f32 %v487_v7, %v486_v61 }
  0x4c   : > { %v472_v33 = vsub.f32 0.0, %v469_v26  ;;  %v503_v34 = vadd.f32 %v502_v27, %v501_v25  ;;  %vm547_vm4 = vcmp.eq.s32.totalorder %v546_v3, 0  ;;  %vm549_vm5 = vcmp.eq.s32.totalorder %v546_v3, 1 }
  0x4d   : > { %v473_v35 = vsub.f32 0.0, %v470_v30  ;;  %v474_v36 = vmul.f32 %v471_v31, %v456_v51  ;;  %v504_v37 = vsel %vm434_vm0, %v488_v32, 0.0  ;;  %vm554_vm6 = vcmp.eq.s32.totalorder %v546_v3, 2 }
  0x4e   : > { %v475_v38 = vmul.f32 %v472_v33, %v457_v19  ;;  %v505_v39 = vadd.f32 %v504_v37, %v503_v34  ;;  %vm556_vm7 = vcmp.eq.s32.totalorder %v546_v3, 3  ;;  %vm558_vm8 = vcmp.eq.s32.totalorder %v546_v3, 4 }
  0x4f   : > { %v476_v40 = vmul.f32 %v473_v35, %v458_v29 }
  0x50   : > { %v477_v41 = vadd.f32 %v475_v38, %v474_v36  ;;  %v506_v42 = vrot.slane %v505_v39, 4 }
  0x51   : > { %v478_v43 = vsel %vm434_vm0, %v476_v40, 0.0 }
  0x52   : > { %v479_v44 = vadd.f32 %v478_v43, %v477_v41  ;;  %v507_v45 = vadd.f32 %v506_v42, %v505_v39 }
  0x54   : > { %v480_v46 = vrot.slane %v479_v44, 4  ;;  %v508_v47 = vrot.slane %v507_v45, 2 }
  0x56   : > { %v481_v50 = vadd.f32 %v480_v46, %v479_v44  ;;  %v509_v51 = vadd.f32 %v508_v47, %v507_v45 }
  0x58   : > { %v482_v52 = vrot.slane %v481_v50, 2  ;;  %v510_v53 = vrot.slane %v509_v51, 1 }
  0x5a   : > { %v483_v55 = vadd.f32 %v482_v52, %v481_v50  ;;  %v511_v56 = vadd.f32 %v510_v53, %v509_v51 }
  0x5c   : > { %v484_v58 = vrot.slane %v483_v55, 1  ;;  %v515_v59 = vadd.f32 %v514_v54, %v511_v56 }
  0x5e   : > { %v485_v60 = vadd.f32 %v484_v58, %v483_v55  ;;  %v519_v61 = vmul.f32 %v795_v57, %v515_v59 }
  0x60   : > { %v489_v62 = vadd.f32 %v488_v32, %v485_v60  ;;  %v520_v63 = vsel %vm491_vm3, %v519_v61, 0.0 }
  0x61   : > { %521 = vadd.xlane.f32.xlu1 %v520_v63 }
  0x62   : > { %v490_v24 = vmul.f32 %v489_v62, %v1080_v1 }
  0x64   : > { %v492_v0 = vsel %vm491_vm3, %v490_v24, 0.0 }
  0x65   : > { %493 = vadd.xlane.f32.xlu0 %v492_v0 }
  0xb2   : > { %v526_v15 = vpop.xlane.xlu2 %525 }
  0xb7   : > { %v496_v5 = vpop.xlane.xlu1 %495 }
  0xbe   : > { %v544_v4 = vpop.xlane.xlu0 %543 }
  0xbf   : > { %v548_v9 = vsel %vm547_vm4, %v544_v4, 0.0 }
  0xc0   : > { %v551_v10 = vrot.slane %v548_v9, 4 }
  0xd4   : > { %v522_v1 = vpop.xlane.xlu1 %521 }
  0xd8   : > { %v494_v11 = vpop.xlane.xlu0 %493 }
  0xd9   : > { %v553_v12 = vsel %vm549_vm5, %v494_v11, %v551_v10 }
  0xda   : > { %v555_v13 = vsel %vm554_vm6, %v496_v5, %v553_v12 }
  0xdb   : > { %v557_v14 = vsel %vm556_vm7, %v522_v1, %v555_v13 }
  0xdc   : > { %v560_v17 = vrot.slane %v557_v14, 4 }
  0xde   : > { %v562_v6 = vsel %vm558_vm8, %v526_v15, %v560_v17 }
  0xdf   : > { %563 = vst [vmem:[%s392_s15] sm:$0x1] %v562_v6 }
  0xe0   : > { %839 = shalt.err (!%p836_p11)
}
  0xe1   : > { %724 = dma.vmem_to_hbm [thread:$0]  (%p998_p8), %s578_s30, 16, %s580_s10, %s565_s21  }
  0xe2 PF: > { %p730_p12 = scmp.ge.s32.totalorder %s906_s25, 2  ;;  %s591_s6 = sand.u32 1, %s878_s18  }
  0xe3   : > { %s592_s26 = scalar_lea.sflag [#allocation5], %s591_s6 }
  0xe4   : > { %p727_p13 = pnand %p730_p12, %p1002_p9 }
  0xe6   : > { %p728_p0 = pneg %p727_p13 }
  0xe8   : > { %873 = dma.done.wait (%p728_p0), %s592_s26, 16  }
  0xe9   : > { %875 = vsyncadd (%p728_p0), %s592_s26, 4294967280  ;;  %s18_s25 = sadd.s32 1, %s906_s25   ;;  %s1155_s18 = smov %s882_s19 }
  0xea   : > { %p15_p1 = scmp.ge.s32.totalorder %s18_s25, 6   ;;  %s1156_s19 = smov %s886_s20 }
  0xeb   : > { %s1157_s20 = smov %s1010_s12  ;;  %s1158_s21 = smov %s898_s23 }
  0xec   : > { %s1159_s22 = smov %s902_s24  ;;  %s1160_s23 = smov %s1163_s28 }
  0xed   : > { %s1161_s24 = smov %s1167_s29  ;;  %17 = sbr.rel (!%p15_p1) target bundleno = 5 (0x5), region = 173 }
  0xf2   :  { %597 = vsyncpa [#allocation5], 1 }
  0xf3   :  { %599 = vsyncpa [#allocation5 + $0x1], 1 }

</bundles_post_ra>
